<compile_context>
chip_gen: v7x
topology: tpu7x:2x2x1
jax: 0.10.0
libtpu: 0.0.40
codegen_flags: <defaults>
</compile_context>

<pallas_src>
import functools

import jax
import jax.numpy as jnp
from jax.experimental import pallas as pl
from jax.experimental.pallas import tpu as pltpu


def _linear_kernel(x_ref, w_ref, b_ref, o_ref):
    # x_ref: (tm, Kf)   w_ref: (Kf, Nf)   b_ref: (1, Nf) f32   o_ref: (tm, Nf)
    acc = jnp.dot(x_ref[...], w_ref[...], preferred_element_type=jnp.float32)
    o_ref[...] = (acc + b_ref[...]).astype(o_ref.dtype)


def _pick_fold(m, out_dim):
    """Fold factor for the lane-dense reformulation (block-diagonal weight)."""
    if out_dim % 128 == 0:          # already lane-dense, folding buys nothing
        return 1
    for f in (4, 2):
        if m % f == 0 and out_dim * f <= 512:
            return f
    return 1


@functools.partial(jax.jit, static_argnames=("stream_dtype",))
def change_dim_wavelet_forward(wavelet_feature, weight, bias, *, stream_dtype=None):
    """Equivalent of nn.Linear(input_dim, output_dim)(wavelet_feature).

    wavelet_feature: [..., input_dim]
    weight:          [output_dim, input_dim]   (PyTorch convention)
    bias:            [output_dim]
    stream_dtype:    optional dtype (e.g. jnp.bfloat16) to stream x / W in;
                     accumulation stays f32, output dtype = input dtype.
    returns:         [..., output_dim]
    """
    in_dim = wavelet_feature.shape[-1]
    out_dim = weight.shape[0]
    lead = wavelet_feature.shape[:-1]
    out_dtype = wavelet_feature.dtype
    out_isz = jnp.dtype(out_dtype).itemsize

    x2d = wavelet_feature.reshape(-1, in_dim)
    m = x2d.shape[0]

    x_dtype = jnp.dtype(stream_dtype) if stream_dtype is not None else jnp.dtype(x2d.dtype)
    x_isz = x_dtype.itemsize

    # ---- fold-by-4 lane-dense reformulation (pure reshape + tiny constant W) ----
    fold = _pick_fold(m, out_dim)
    m_f = m // fold
    k_f = fold * in_dim
    n_f = fold * out_dim

    x_f = x2d.reshape(m_f, k_f).astype(x_dtype)                      # (Mf, Kf)
    w_f = jnp.kron(jnp.eye(fold, dtype=weight.dtype), weight.T)       # block-diag W^T
    w_f = w_f.astype(x_dtype)                                         # (Kf, Nf)
    b_f = jnp.tile(bias.astype(jnp.float32), fold).reshape(1, n_f)    # (1,  Nf) f32

    # ---- row-tile selection --------------------------------------------------
    sub = max(8, 32 // x_isz)                  # sublane multiple (8 f32, 16 bf16)
    bpr = k_f * x_isz + n_f * out_isz          # streamed bytes per folded row
    target_rows = max(sub, ((4 << 20) // bpr) // sub * sub)   # ~4 MiB per grid step
    floor_rows = max(sub, ((1 << 20) // bpr) // sub * sub)    # >=1 MiB per grid step
    tm = target_rows
    # keep >= ~8 grid steps so v7x's two TensorCores both get work, but only
    # if that does not push the per-step payload under the ~1 MiB floor.
    eighth = (m_f // 8) // sub * sub
    if eighth >= floor_rows:
        tm = min(tm, eighth)
    if tm >= m_f:
        tm = m_f                               # single full block (legal: equals dim)
    grid = (pl.cdiv(m_f, tm),)                 # ragged final block OK, no padding

    # ---- VMEM budget (double-buffered tiles + resident W/bias + margin) -------
    x_tile = tm * k_f * x_isz
    o_tile = tm * n_f * out_isz
    resident = k_f * n_f * x_isz + n_f * 4
    vmem_limit = int(2 * (x_tile + o_tile) + 2 * resident + (4 << 20))
    vmem_limit = min(max(vmem_limit, 16 << 20), 40 << 20)     # fits v7x 64 MiB VMEM

    cost = pl.CostEstimate(
        flops=2 * m_f * k_f * n_f,
        transcendentals=0,
        bytes_accessed=(m_f * k_f * x_isz + k_f * n_f * x_isz
                        + m_f * n_f * out_isz + n_f * 4),
    )

    out_f = pl.pallas_call(
        _linear_kernel,
        out_shape=jax.ShapeDtypeStruct((m_f, n_f), out_dtype),
        grid=grid,
        in_specs=[
            pl.BlockSpec((tm, k_f), lambda i: (i, 0)),      # streamed x tile
            pl.BlockSpec((k_f, n_f), lambda i: (0, 0)),     # resident block-diag W^T
            pl.BlockSpec((1, n_f), lambda i: (0, 0)),       # resident bias (f32)
        ],
        out_specs=pl.BlockSpec((tm, n_f), lambda i: (i, 0)),
        compiler_params=pltpu.CompilerParams(
            dimension_semantics=("parallel",),
            vmem_limit_bytes=vmem_limit,
        ),
        cost_estimate=cost,
    )(x_f, w_f, b_f)

    # (Mf, Nf) row-major is exactly (M, out_dim) row-major -> plain reshape.
    return out_f.reshape(*lead, out_dim)


def init_linear_params(key, input_dim, output_dim, dtype=jnp.float32):
    # Deterministic init mirroring nn.Linear's kaiming-uniform-ish bound.
    kw, kb = jax.random.split(key)
    bound = 1.0 / (input_dim ** 0.5)
    weight = jax.random.uniform(kw, (output_dim, input_dim), dtype,
                                minval=-bound, maxval=bound)
    bias = jax.random.uniform(kb, (output_dim,), dtype,
                              minval=-bound, maxval=bound)
    return weight, bias


if __name__ == "__main__":
    key = jax.random.PRNGKey(0)
    k_x, k_p, k_x2, k_x3, k_x4 = jax.random.split(key, 5)

    batch, seq, input_dim, output_dim = 2, 8, 32, 64
    weight, bias = init_linear_params(k_p, input_dim, output_dim)

    # 1) Spec-sized check (fold=4, single block).
    x = jax.random.normal(k_x, (batch, seq, input_dim), dtype=jnp.float32)
    out = jax.block_until_ready(change_dim_wavelet_forward(x, weight, bias))
    ref = x @ weight.T + bias
    assert out.shape == (batch, seq, output_dim)
    assert jnp.allclose(out, ref, atol=1e-5, rtol=1e-5)

    # 2) Odd M (fold=1 fallback, whole-array block, no padding anywhere).
    x_odd = jax.random.normal(k_x2, (3, 5, input_dim), dtype=jnp.float32)
    out_odd = jax.block_until_ready(change_dim_wavelet_forward(x_odd, weight, bias))
    ref_odd = x_odd @ weight.T + bias
    assert out_odd.shape == (3, 5, output_dim)
    assert jnp.allclose(out_odd, ref_odd, atol=1e-5, rtol=1e-5)

    # 3) Larger M with bf16 streaming (multi-step parallel grid, f32 accumulation).
    x_big = jax.random.normal(k_x3, (64, 512, input_dim), dtype=jnp.float32)
    out_big = jax.block_until_ready(
        change_dim_wavelet_forward(x_big, weight, bias, stream_dtype=jnp.bfloat16))
    ref_big = x_big @ weight.T + bias
    assert out_big.shape == (64, 512, output_dim)
    assert jnp.allclose(out_big, ref_big, atol=5e-2, rtol=5e-2)

    # 4) Non-tile-multiple M (exercises the ragged final block, still no padding).
    x_rag = jax.random.normal(k_x4, (75, 160, input_dim), dtype=jnp.float32)
    out_rag = jax.block_until_ready(change_dim_wavelet_forward(x_rag, weight, bias))
    ref_rag = x_rag @ weight.T + bias
    assert out_rag.shape == (75, 160, output_dim)
    assert jnp.allclose(out_rag, ref_rag, atol=1e-5, rtol=1e-5)

    print("KERNEL_OK")
</pallas_src>

<mosaic_0001>
module attributes {stable_mosaic.version = 11 : i64} {
  func.func @_linear_kernel(%arg0: i32, %arg1: memref<4x128xf32, #tpu.memory_space<vmem>>, %arg2: memref<128x256xf32, #tpu.memory_space<vmem>>, %arg3: memref<1x256xf32, #tpu.memory_space<vmem>>, %arg4: memref<4x256xf32, #tpu.memory_space<vmem>>) attributes {dimension_semantics = [#tpu.dimension_semantics<parallel>], iteration_bounds = array<i64: 1>, scalar_prefetch = 0 : i64, scratch_operands = 0 : i64, tpu.core_type = #tpu.core_type<tc>, window_params = [{transform_indices = @transform_0, window_bounds = array<i64: 4, 128>}, {pipeline_mode = #tpu.pipeline_mode<synchronous>, transform_indices = @transform_1, window_bounds = array<i64: 128, 256>}, {pipeline_mode = #tpu.pipeline_mode<synchronous>, transform_indices = @transform_2, window_bounds = array<i64: 1, 256>}, {transform_indices = @transform_3, window_bounds = array<i64: 4, 256>}]} {
    %c0 = arith.constant 0 : index
    %c0_0 = arith.constant 0 : index
    %0 = vector.load %arg1[%c0, %c0_0] : memref<4x128xf32, #tpu.memory_space<vmem>>, vector<4x128xf32>
    %c0_1 = arith.constant 0 : index
    %c0_2 = arith.constant 0 : index
    %1 = vector.load %arg2[%c0_1, %c0_2] : memref<128x256xf32, #tpu.memory_space<vmem>>, vector<128x256xf32>
    %cst = arith.constant dense<0.000000e+00> : vector<4x256xf32>
    %2 = tpu.matmul %0, %1, %cst {dimension_numbers = #tpu.dot_dimension_numbers<[1], [0], [0], [1], [0, 0, 1, 1], [], []>} : vector<4x128xf32>, vector<128x256xf32>, vector<4x256xf32> -> vector<4x256xf32>
    %c0_3 = arith.constant 0 : index
    %c0_4 = arith.constant 0 : index
    %3 = vector.load %arg3[%c0_3, %c0_4] : memref<1x256xf32, #tpu.memory_space<vmem>>, vector<1x256xf32>
    %4 = vector.broadcast %3 : vector<1x256xf32> to vector<4x256xf32>
    %5 = arith.addf %2, %4 : vector<4x256xf32>
    %c0_5 = arith.constant 0 : index
    %c0_6 = arith.constant 0 : index
    %6 = vector.load %arg4[%c0_5, %c0_6] : memref<4x256xf32, #tpu.memory_space<vmem>>, vector<4x256xf32>
    tpu.vector_store %arg4[%c0_5, %c0_6], %5 {strides = array<i32>} : memref<4x256xf32, #tpu.memory_space<vmem>>, vector<4x256xf32>,
    return
  }
  func.func @transform_0(%arg0: i32) -> (i32, i32) {
    %c0_i32 = arith.constant 0 : i32
    %c0_i32_0 = arith.constant 0 : i32
    return %arg0, %c0_i32 : i32, i32
  }
  func.func @transform_1(%arg0: i32) -> (i32, i32) {
    %c0_i32 = arith.constant 0 : i32
    %c0_i32_0 = arith.constant 0 : i32
    %c0_i32_1 = arith.constant 0 : i32
    return %c0_i32, %c0_i32_0 : i32, i32
  }
  func.func @transform_2(%arg0: i32) -> (i32, i32) {
    %c0_i32 = arith.constant 0 : i32
    %c0_i32_0 = arith.constant 0 : i32
    %c0_i32_1 = arith.constant 0 : i32
    return %c0_i32, %c0_i32_0 : i32, i32
  }
  func.func @transform_3(%arg0: i32) -> (i32, i32) {
    %c0_i32 = arith.constant 0 : i32
    %c0_i32_0 = arith.constant 0 : i32
    return %arg0, %c0_i32 : i32, i32
  }
}

</mosaic_0001>

<bundles_post_ra>
// kernel: tile.8
= control target key start
LH: loop header
LB: loop body
LE: loop exit
PB: predicated region body
PF: predicated region fallthrough
CT: control target
= control target key end

     0   :  { %s22_s0 = inlined_call_operand.vmem [shape: f32[64], index: 0, kind: input, shape index: {}]   ;;  %s23_s1 = inlined_call_operand.vmem [shape: f32[4,64], index: 1, kind: output, shape index: {}]  }
   0x1   :  { %v4_v0 = vld [vmem:[%s22_s0] ss:$0 sm:$0xff] }
   0x2   :  { %5 = vst [vmem:[%s23_s1] sm:$0xf] %v4_v0 }

// kernel: tile.9
= control target key start
LH: loop header
LB: loop body
LE: loop exit
PB: predicated region body
PF: predicated region fallthrough
CT: control target
= control target key end

     0   :  { %s6_s8 = smov 3  ;;  %vm8_vm0 = vcmask 523264   ;;  %s30_s9 = smov 64   ;;  %vm15_vm1 = vcmask 1048064   ;;  %s50_s0 = inlined_call_operand.vmem [shape: f32[4,64], index: 0, kind: input, shape index: {}]   ;;  %s51_s1 = inlined_call_operand.vmem [shape: f32[1,256], index: 1, kind: output, shape index: {}]  }
   0x1   :  { %v4_v0 = vld [vmem:[%s50_s0] sm:$0xf]  ;;  %s11_s0 = smov 3 }
   0x2   :  { %5 = vst [vmem:[#allocation1] sm:$0xf] %v4_v0 }
   0x9   :  { %v12_v1 = vld [vmem:[#allocation1 + $0x1] ss:$2 sm:%s11_s0]   ;;  %v7_v2 = vld [vmem:[#allocation1] ss:$2 sm:%s6_s8]  }
   0xa   :  { %13 = vrot.lane.b32.xlu0 %v12_v1, %s30_s9  ;;  %9 = vst.msk [vmem:[#allocation0] ss:$8 sm:$0x3] %vm8_vm0, %v7_v2  }
  0x7c   :  { %v14_v3 = vpop.permute.xlu0 %13  }
  0x7d   :  { %16 = vst.msk [vmem:[#allocation0] ss:$8 sm:$0x3] %vm15_vm1, %v14_v3  }
  0x84   :  { %v20_v4 = vld [vmem:[#allocation0] sm:$0x1]  ;;  %v24_v5 = vld [vmem:[#allocation0 + $0x8] sm:$0x1] }
  0x85   :  { %22 = vst [vmem:[%s51_s1] sm:$0x1] %v20_v4  ;;  %28 = vst [vmem:[%s51_s1 + $0x1] sm:$0x1] %v24_v5 }

// kernel: change_dim_wavelet_forward.1
= control target key start
LH: loop header
LB: loop body
LE: loop exit
PB: predicated region body
PF: predicated region fallthrough
CT: control target
= control target key end

     0   :  { %v172_v3 = vmov 0.0   ;;  %v49_v50 = vlaneseq  ;;  %s298_s1 = inlined_call_operand.vmem [shape: f32[128,256], index: 1, kind: input, shape index: {}]   ;;  %s299_s0 = inlined_call_operand.vmem [shape: f32[4,128], index: 0, kind: input, shape index: {}]   ;;  %s300_s2 = inlined_call_operand.vmem [shape: f32[1,256], index: 2, kind: input, shape index: {}]   ;;  %s301_s3 = inlined_call_operand.vmem [shape: f32[4,256], index: 3, kind: output, shape index: {}]  }
   0x1   :  { %v16_v0 = vld [vmem:[%s298_s1 + $0x8] sm:$0xff]  ;;  %v18_v1 = vld [vmem:[%s298_s1 + $0x18] sm:$0xff]  ;;  %v15_v2 = vld [vmem:[%s298_s1] sm:$0xff]  ;;  %123 = vmatprep.mubr.f32.mxu0 %v172_v3 }
   0x2   :  { %v139_v4 = vpack.c.bf16 %v18_v1, %v16_v0  ;;  %v17_v5 = vld [vmem:[%s298_s1 + $0x10] sm:$0xff]  ;;  %v20_v6 = vld [vmem:[%s298_s1 + $0x28] sm:$0xff]  ;;  %v22_v7 = vld [vmem:[%s298_s1 + $0x38] sm:$0xff]  ;;  %v50_v51 = vshrl.u32 %v49_v50, 7 }
   0x3   :  { %v141_v8 = vpack.c.bf16 %v17_v5, %v15_v2  ;;  %v143_v9 = vpack.c.bf16 %v22_v7, %v20_v6  ;;  %v19_v10 = vld [vmem:[%s298_s1 + $0x20] sm:$0xff]  ;;  %v21_v11 = vld [vmem:[%s298_s1 + $0x30] sm:$0xff]  ;;  %v24_v12 = vld [vmem:[%s298_s1 + $0x48] sm:$0xff] }
   0x4   :  { %140 = vmatprep.subr.bf16.mxu0 %v139_v4  ;;  %v26_v13 = vld [vmem:[%s298_s1 + $0x58] sm:$0xff]  ;;  %v145_v14 = vpack.c.bf16 %v21_v11, %v19_v10  ;;  %v23_v16 = vld [vmem:[%s298_s1 + $0x40] sm:$0xff]  ;;  %v25_v17 = vld [vmem:[%s298_s1 + $0x50] sm:$0xff]  ;;  %v51_v52 = vsub.s32 0, %v50_v51  ;;  %v55_v54 = vsub.s32 1, %v50_v51 }
   0x5   :  { %142 = vmatpush1.bf16.msra.mxu0 %v141_v8  ;;  %v147_v15 = vpack.c.bf16 %v26_v13, %v24_v12  ;;  %v28_v18 = vld [vmem:[%s298_s1 + $0x68] sm:$0xff]  ;;  %v30_v19 = vld [vmem:[%s298_s1 + $0x78] sm:$0xff]  ;;  %v149_v20 = vpack.c.bf16 %v25_v17, %v23_v16  ;;  %v27_v22 = vld [vmem:[%s298_s1 + $0x60] sm:$0xff] }
   0x6   :  { %144 = vmatprep.subr.bf16.mxu0 %v143_v9  ;;  %v151_v21 = vpack.c.bf16 %v30_v19, %v28_v18  ;;  %v29_v23 = vld [vmem:[%s298_s1 + $0x70] sm:$0xff]  ;;  %v32_v24 = vld [vmem:[%s298_s1 + $0x88] sm:$0xff]  ;;  %v34_v25 = vld [vmem:[%s298_s1 + $0x98] sm:$0xff] }
   0x7   :  { %v153_v26 = vpack.c.bf16 %v29_v23, %v27_v22  ;;  %v155_v27 = vpack.c.bf16 %v34_v25, %v32_v24  ;;  %v31_v28 = vld [vmem:[%s298_s1 + $0x80] sm:$0xff]  ;;  %v33_v29 = vld [vmem:[%s298_s1 + $0x90] sm:$0xff]  ;;  %v36_v30 = vld [vmem:[%s298_s1 + $0xa8] sm:$0xff] }
   0x8   :  { %v38_v31 = vld [vmem:[%s298_s1 + $0xb8] sm:$0xff]  ;;  %v157_v32 = vpack.c.bf16 %v33_v29, %v31_v28  ;;  %v35_v34 = vld [vmem:[%s298_s1 + $0xa0] sm:$0xff]  ;;  %v37_v35 = vld [vmem:[%s298_s1 + $0xb0] sm:$0xff] }
   0x9   :  { %146 = vmatpush1.bf16.msra.mxu0 %v145_v14  ;;  %v159_v33 = vpack.c.bf16 %v38_v31, %v36_v30  ;;  %v40_v36 = vld [vmem:[%s298_s1 + $0xc8] sm:$0xff]  ;;  %v42_v37 = vld [vmem:[%s298_s1 + $0xd8] sm:$0xff]  ;;  %v161_v38 = vpack.c.bf16 %v37_v35, %v35_v34  ;;  %v39_v40 = vld [vmem:[%s298_s1 + $0xc0] sm:$0xff] }
   0xa   :  { %148 = vmatprep.subr.bf16.mxu0 %v147_v15  ;;  %v163_v39 = vpack.c.bf16 %v42_v37, %v40_v36  ;;  %v41_v41 = vld [vmem:[%s298_s1 + $0xd0] sm:$0xff]  ;;  %v44_v42 = vld [vmem:[%s298_s1 + $0xe8] sm:$0xff]  ;;  %v46_v43 = vld [vmem:[%s298_s1 + $0xf8] sm:$0xff] }
   0xb   :  { %v165_v44 = vpack.c.bf16 %v41_v41, %v39_v40  ;;  %v167_v45 = vpack.c.bf16 %v46_v43, %v44_v42  ;;  %v43_v46 = vld [vmem:[%s298_s1 + $0xe0] sm:$0xff]  ;;  %v45_v47 = vld [vmem:[%s298_s1 + $0xf0] sm:$0xff] }
   0xc   :  { %v169_v48 = vpack.c.bf16 %v45_v47, %v43_v46  ;;  %v14_v49 = vld [vmem:[%s299_s0] sm:$0xf] }
   0xd   :  { %150 = vmatpush1.bf16.msra.mxu0 %v149_v20  ;;  %v47_v53 = vld [vmem:[%s300_s2] sm:$0x3] }
   0xe   :  { %152 = vmatprep.subr.bf16.mxu0 %v151_v21  ;;  %v52_v55 = vrot.slane %v47_v53, %v51_v52  ;;  %v56_v56 = vrot.slane %v47_v53, %v55_v54 }
  0x11   :  { %154 = vmatpush1.bf16.msra.mxu0 %v153_v26 }
  0x12   :  { %156 = vmatprep.subr.bf16.mxu0 %v155_v27 }
  0x15   :  { %158 = vmatpush1.bf16.msra.mxu0 %v157_v32 }
  0x16   :  { %160 = vmatprep.subr.bf16.mxu0 %v159_v33 }
  0x19   :  { %162 = vmatpush1.bf16.msra.mxu0 %v161_v38 }
  0x1a   :  { %164 = vmatprep.subr.bf16.mxu0 %v163_v39 }
  0x1d   :  { %166 = vmatpush1.bf16.msra.mxu0 %v165_v44 }
  0x1e   :  { %168 = vmatprep.subr.bf16.mxu0 %v167_v45 }
  0x21   :  { %170 = vmatpush1.bf16.msra.mxu0 %v169_v48 }
  0x24   :  { %124 = vmatmul.mubr.f32.vlgmr.msra.gmra.mrb[0].mxu0 %v14_v49 }
  0xf7   :  { %v125_v57 = vpop.f32.mrb[0].mxu0 }
  0xf8   :  { %v126_v58 = vadd.f32 %v125_v57, %v52_v55  ;;  %v127_v59 = vpop.f32.mrb[1].mxu0 }
  0xf9   :  { %v128_v60 = vadd.f32 %v127_v59, %v56_v56 }
  0xfb   :  { %v132_v61 = vcombine.low %v126_v58, %v128_v60 }
  0xfd   :  { %134 = vst [vmem:[%s301_s3] sm:$0xff] %v132_v61 }

</bundles_post_ra>
